<compile_context>
chip_gen: v6e
topology: v6e:2x2x1
jax: 0.10.0
libtpu: 0.0.40
codegen_flags: <defaults>
</compile_context>

<pallas_src>
import functools

import jax
import jax.numpy as jnp
from jax import lax
from jax.experimental import pallas as pl
from jax.experimental.pallas import tpu as pltpu

BN_EPS = 1e-5
_VMEM_BUDGET = 40 << 20
_VMEM_LIMIT = 48 << 20


def _pick_tile(dim, max_tile, quanta=(256, 128)):
    """Largest quantum-aligned divisor of `dim` that is <= max_tile.

    Prefers 256-aligned tiles (full MXU tiles on v6e/v7x), falls back to
    128-aligned, then to the full dimension (always a legal block size), so
    blocks tile the array exactly and no ragged-tile masking is needed.
    """
    for q in quanta:
        t = (min(max_tile, dim) // q) * q
        while t >= q:
            if dim % t == 0:
                return t
            t -= q
    return dim


# ---------------------------------------------------------------------------
# Pass A: BatchNorm (two-pass stats) + cast, writes z1 transposed and z2.
# grid = (D_tiles,); each step sees the full batch for one column slab.
# ---------------------------------------------------------------------------
def _normalize_kernel(x1_ref, x2_ref, z1t_ref, z2_ref, *, inv_sqrt_b, z_dtype):
    def norm(x):
        x = x.astype(jnp.float32)
        m = jnp.mean(x, axis=0, keepdims=True)
        xc = x - m
        v = jnp.mean(xc * xc, axis=0, keepdims=True)        # biased variance
        scale = lax.rsqrt(v + BN_EPS) * jnp.float32(inv_sqrt_b)
        return xc * scale                                    # z / sqrt(B)

    z1 = norm(x1_ref[...])
    z2 = norm(x2_ref[...])
    # Transpose z1 once here (streaming pass) so pass B never touches the XLU.
    z1t_ref[...] = z1.T.astype(z_dtype)
    z2_ref[...] = z2.astype(z_dtype)


# ---------------------------------------------------------------------------
# Pass B: tiled cross-correlation + fused loss reduction.
# grid = (row_tiles, col_tiles); ("parallel", "parallel").
# ---------------------------------------------------------------------------
def _corr_loss_kernel(z1t_ref, z2_ref, out_ref, *, lambda_coeff):
    i = pl.program_id(0)
    j = pl.program_id(1)
    lam = jnp.float32(lambda_coeff)

    # (TD, N) x (N, TD) -> (TD, TD), already equals the c tile because
    # 1/sqrt(ssl_batch_size) was folded into both operands in pass A.
    c = jnp.dot(z1t_ref[...], z2_ref[...], preferred_element_type=jnp.float32)

    # Single-pass loss: lambda * sum(c^2) everywhere ...
    part = lam * jnp.sum(c * c)
    out_ref[...] = jnp.full((1, 1, 1), part, dtype=jnp.float32)

    # ... plus a diagonal-only correction, evaluated only on diagonal tiles.
    @pl.when(i == j)
    def _():
        rows = lax.broadcasted_iota(jnp.int32, c.shape, 0)
        cols = lax.broadcasted_iota(jnp.int32, c.shape, 1)
        corr = jnp.sum(jnp.where(rows == cols,
                                 (c - 1.0) ** 2 - lam * (c * c), 0.0))
        out_ref[...] = jnp.full((1, 1, 1), part + corr, dtype=jnp.float32)


def barlow_loss(x_1, x_2, ssl_batch_size, lambda_coeff, *,
                use_bf16=True, max_td=1024):
    N, D = x_1.shape
    assert x_2.shape == (N, D)
    # Note: PyTorch module divides c by ssl_batch_size (not N); we keep that.
    z_dtype = jnp.bfloat16 if use_bf16 else jnp.float32
    zbytes = jnp.dtype(z_dtype).itemsize

    def fits(td):
        # Pass B: double-buffered z1t + z2 blocks plus f32 c tile/temps.
        pass_b = 2 * 2 * td * N * zbytes + 2 * td * td * 4
        # Pass A: double-buffered f32 inputs plus z outputs.
        pass_a = 2 * 2 * N * td * 4 + 2 * 2 * N * td * zbytes
        return max(pass_a, pass_b) <= _VMEM_BUDGET

    TD = _pick_tile(D, max_td)
    while TD > 128 and not fits(TD):
        new_td = _pick_tile(D, TD - 128)
        if new_td >= TD:
            break
        TD = new_td
    gi = D // TD

    # ---- Pass A: BatchNorm + cast (z1 stored transposed) -----------------
    norm_kernel = functools.partial(
        _normalize_kernel,
        inv_sqrt_b=float(ssl_batch_size) ** -0.5,
        z_dtype=z_dtype)

    z1t, z2 = pl.pallas_call(
        norm_kernel,
        out_shape=(
            jax.ShapeDtypeStruct((D, N), z_dtype),   # z1 transposed
            jax.ShapeDtypeStruct((N, D), z_dtype),   # z2
        ),
        grid_spec=pltpu.PrefetchScalarGridSpec(
            num_scalar_prefetch=0,
            grid=(gi,),
            in_specs=[
                pl.BlockSpec((N, TD), lambda d: (0, d)),
                pl.BlockSpec((N, TD), lambda d: (0, d)),
            ],
            out_specs=(
                pl.BlockSpec((TD, N), lambda d: (d, 0)),
                pl.BlockSpec((N, TD), lambda d: (0, d)),
            ),
        ),
        compiler_params=pltpu.CompilerParams(
            dimension_semantics=("parallel",),
            vmem_limit_bytes=_VMEM_LIMIT),
    )(x_1, x_2)

    # ---- Pass B: correlation tiles + loss ---------------------------------
    main_kernel = functools.partial(
        _corr_loss_kernel, lambda_coeff=float(lambda_coeff))

    partials = pl.pallas_call(
        main_kernel,
        out_shape=jax.ShapeDtypeStruct((gi * gi, 1, 1), jnp.float32),
        grid_spec=pltpu.PrefetchScalarGridSpec(
            num_scalar_prefetch=0,
            grid=(gi, gi),
            in_specs=[
                # Row slab: block index invariant along j -> stays resident.
                pl.BlockSpec((TD, N), lambda i, j: (i, 0)),
                # Column slab: streamed along j.
                pl.BlockSpec((N, TD), lambda i, j: (0, j)),
            ],
            out_specs=pl.BlockSpec((1, 1, 1), lambda i, j, _gj=gi: (i * _gj + j, 0, 0)),
        ),
        compiler_params=pltpu.CompilerParams(
            dimension_semantics=("parallel", "parallel"),
            vmem_limit_bytes=_VMEM_LIMIT),
    )(z1t, z2)

    # Tiny (gi*gj)-element reduction outside the kernel so both grid axes can
    # stay "parallel" (v7x megacore sharding).
    return jnp.sum(partials)


def barlow_loss_ref(x_1, x_2, ssl_batch_size, lambda_coeff):
    """Pure-JAX reference matching the PyTorch module."""
    def bn(x):
        m = jnp.mean(x, axis=0)
        v = jnp.mean((x - m) ** 2, axis=0)
        return (x - m) / jnp.sqrt(v + BN_EPS)

    z1, z2 = bn(x_1), bn(x_2)
    c = jnp.matmul(z1.T, z2, precision=lax.Precision.HIGHEST) / ssl_batch_size
    on = jnp.sum((jnp.diag(c) - 1.0) ** 2)
    off = jnp.sum(c ** 2) - jnp.sum(jnp.diag(c) ** 2)
    return on + lambda_coeff * off


if __name__ == "__main__":
    key = jax.random.PRNGKey(0)
    lambda_coeff = 5e-3

    # Case 1: module-sized small config (ssl_batch_size=8, embedding_size=32)
    # -> single-tile grids.
    N, D = 8, 32
    k1, k2, k3, k4 = jax.random.split(key, 4)
    x_1 = jax.random.normal(k1, (N, D), dtype=jnp.float32)
    x_2 = jax.random.normal(k2, (N, D), dtype=jnp.float32)
    ref = barlow_loss_ref(x_1, x_2, N, lambda_coeff)

    loss_f32 = jax.block_until_ready(
        barlow_loss(x_1, x_2, N, lambda_coeff, use_bf16=False))
    assert jnp.allclose(loss_f32, ref, rtol=1e-3, atol=1e-3), (loss_f32, ref)

    loss_bf16 = jax.block_until_ready(
        barlow_loss(x_1, x_2, N, lambda_coeff, use_bf16=True))
    assert jnp.allclose(loss_bf16, ref, rtol=2e-2, atol=2e-2), (loss_bf16, ref)

    # Case 2: multi-tile path (forced TD=128 -> grid (2, 2)): diagonal and
    # off-diagonal tiles, resident row slab, per-(i,j) partial outputs.
    N2, D2 = 16, 256
    y_1 = jax.random.normal(k3, (N2, D2), dtype=jnp.float32)
    y_2 = jax.random.normal(k4, (N2, D2), dtype=jnp.float32)
    ref2 = barlow_loss_ref(y_1, y_2, N2, lambda_coeff)

    loss2_f32 = jax.block_until_ready(
        barlow_loss(y_1, y_2, N2, lambda_coeff, use_bf16=False, max_td=128))
    assert jnp.allclose(loss2_f32, ref2, rtol=1e-3, atol=1e-3), (loss2_f32, ref2)

    loss2_bf16 = jax.block_until_ready(
        barlow_loss(y_1, y_2, N2, lambda_coeff, use_bf16=True, max_td=128))
    assert jnp.allclose(loss2_bf16, ref2, rtol=2e-2, atol=2e-2), (loss2_bf16, ref2)

    print("KERNEL_OK")
</pallas_src>

<mosaic_0001>
module attributes {stable_mosaic.version = 11 : i64} {
  func.func @_normalize_kernel(%arg0: i32, %arg1: memref<8x32xf32, #tpu.memory_space<vmem>>, %arg2: memref<8x32xf32, #tpu.memory_space<vmem>>, %arg3: memref<32x8xf32, #tpu.memory_space<vmem>>, %arg4: memref<8x32xf32, #tpu.memory_space<vmem>>) attributes {dimension_semantics = [#tpu.dimension_semantics<parallel>], iteration_bounds = array<i64: 1>, scalar_prefetch = 0 : i64, scratch_operands = 0 : i64, tpu.core_type = #tpu.core_type<tc>, window_params = [{transform_indices = @transform_0, window_bounds = array<i64: 8, 32>}, {transform_indices = @transform_1, window_bounds = array<i64: 8, 32>}, {transform_indices = @transform_2, window_bounds = array<i64: 32, 8>}, {transform_indices = @transform_3, window_bounds = array<i64: 8, 32>}]} {
    %c0 = arith.constant 0 : index
    %c0_0 = arith.constant 0 : index
    %0 = vector.load %arg1[%c0, %c0_0] : memref<8x32xf32, #tpu.memory_space<vmem>>, vector<8x32xf32>
    %cst = arith.constant dense<0.000000e+00> : vector<32xf32>
    %1 = vector.multi_reduction <add>, %0, %cst [0] : vector<8x32xf32> to vector<32xf32>
    %2 = vector.shape_cast %1 : vector<32xf32> to vector<1x32xf32>
    %cst_1 = arith.constant 8.000000e+00 : f32
    %3 = vector.broadcast %cst_1 : f32 to vector<1x32xf32>
    %4 = arith.divf %2, %3 : vector<1x32xf32>
    %5 = vector.broadcast %4 : vector<1x32xf32> to vector<8x32xf32>
    %6 = arith.subf %0, %5 : vector<8x32xf32>
    %7 = arith.mulf %6, %6 : vector<8x32xf32>
    %cst_2 = arith.constant dense<0.000000e+00> : vector<32xf32>
    %8 = vector.multi_reduction <add>, %7, %cst_2 [0] : vector<8x32xf32> to vector<32xf32>
    %9 = vector.shape_cast %8 : vector<32xf32> to vector<1x32xf32>
    %cst_3 = arith.constant 8.000000e+00 : f32
    %10 = vector.broadcast %cst_3 : f32 to vector<1x32xf32>
    %11 = arith.divf %9, %10 : vector<1x32xf32>
    %cst_4 = arith.constant 9.99999974E-6 : f32
    %12 = vector.broadcast %cst_4 : f32 to vector<1x32xf32>
    %13 = arith.addf %11, %12 : vector<1x32xf32>
    %14 = math.rsqrt %13 : vector<1x32xf32>
    %cst_5 = arith.constant 0.353553385 : f32
    %15 = vector.broadcast %cst_5 : f32 to vector<1x32xf32>
    %16 = arith.mulf %14, %15 : vector<1x32xf32>
    %17 = vector.broadcast %16 : vector<1x32xf32> to vector<8x32xf32>
    %18 = arith.mulf %6, %17 : vector<8x32xf32>
    %c0_6 = arith.constant 0 : index
    %c0_7 = arith.constant 0 : index
    %19 = vector.load %arg2[%c0_6, %c0_7] : memref<8x32xf32, #tpu.memory_space<vmem>>, vector<8x32xf32>
    %cst_8 = arith.constant dense<0.000000e+00> : vector<32xf32>
    %20 = vector.multi_reduction <add>, %19, %cst_8 [0] : vector<8x32xf32> to vector<32xf32>
    %21 = vector.shape_cast %20 : vector<32xf32> to vector<1x32xf32>
    %cst_9 = arith.constant 8.000000e+00 : f32
    %22 = vector.broadcast %cst_9 : f32 to vector<1x32xf32>
    %23 = arith.divf %21, %22 : vector<1x32xf32>
    %24 = vector.broadcast %23 : vector<1x32xf32> to vector<8x32xf32>
    %25 = arith.subf %19, %24 : vector<8x32xf32>
    %26 = arith.mulf %25, %25 : vector<8x32xf32>
    %cst_10 = arith.constant dense<0.000000e+00> : vector<32xf32>
    %27 = vector.multi_reduction <add>, %26, %cst_10 [0] : vector<8x32xf32> to vector<32xf32>
    %28 = vector.shape_cast %27 : vector<32xf32> to vector<1x32xf32>
    %cst_11 = arith.constant 8.000000e+00 : f32
    %29 = vector.broadcast %cst_11 : f32 to vector<1x32xf32>
    %30 = arith.divf %28, %29 : vector<1x32xf32>
    %cst_12 = arith.constant 9.99999974E-6 : f32
    %31 = vector.broadcast %cst_12 : f32 to vector<1x32xf32>
    %32 = arith.addf %30, %31 : vector<1x32xf32>
    %33 = math.rsqrt %32 : vector<1x32xf32>
    %cst_13 = arith.constant 0.353553385 : f32
    %34 = vector.broadcast %cst_13 : f32 to vector<1x32xf32>
    %35 = arith.mulf %33, %34 : vector<1x32xf32>
    %36 = vector.broadcast %35 : vector<1x32xf32> to vector<8x32xf32>
    %37 = arith.mulf %25, %36 : vector<8x32xf32>
    %38 = tpu.transpose %18, [1, 0] : vector<8x32xf32> -> vector<32x8xf32>
    %c0_14 = arith.constant 0 : index
    %c0_15 = arith.constant 0 : index
    %39 = vector.load %arg3[%c0_14, %c0_15] : memref<32x8xf32, #tpu.memory_space<vmem>>, vector<32x8xf32>
    tpu.vector_store %arg3[%c0_14, %c0_15], %38 {strides = array<i32>} : memref<32x8xf32, #tpu.memory_space<vmem>>, vector<32x8xf32>,
    %c0_16 = arith.constant 0 : index
    %c0_17 = arith.constant 0 : index
    %40 = vector.load %arg4[%c0_16, %c0_17] : memref<8x32xf32, #tpu.memory_space<vmem>>, vector<8x32xf32>
    tpu.vector_store %arg4[%c0_16, %c0_17], %37 {strides = array<i32>} : memref<8x32xf32, #tpu.memory_space<vmem>>, vector<8x32xf32>,
    return
  }
  func.func @transform_0(%arg0: i32) -> (i32, i32) {
    %c0_i32 = arith.constant 0 : i32
    %c0_i32_0 = arith.constant 0 : i32
    return %c0_i32, %arg0 : i32, i32
  }
  func.func @transform_1(%arg0: i32) -> (i32, i32) {
    %c0_i32 = arith.constant 0 : i32
    %c0_i32_0 = arith.constant 0 : i32
    return %c0_i32, %arg0 : i32, i32
  }
  func.func @transform_2(%arg0: i32) -> (i32, i32) {
    %c0_i32 = arith.constant 0 : i32
    %c0_i32_0 = arith.constant 0 : i32
    return %arg0, %c0_i32 : i32, i32
  }
  func.func @transform_3(%arg0: i32) -> (i32, i32) {
    %c0_i32 = arith.constant 0 : i32
    %c0_i32_0 = arith.constant 0 : i32
    return %c0_i32, %arg0 : i32, i32
  }
}

</mosaic_0001>

<bundles_post_ra>
// kernel: tpu_custom_call.1
= control target key start
LH: loop header
LB: loop body
LE: loop exit
PB: predicated region body
PF: predicated region fallthrough
CT: control target
= control target key end

     0   :  { %9 = vsyncpa [#allocation3], 0  ;;  %s267_s0 = inlined_call_operand.hbm [shape: f32[8,32], index: 0, kind: input, shape index: {}]   ;;  %s268_s1 = inlined_call_operand.hbm [shape: f32[8,32], index: 1, kind: input, shape index: {}]   ;;  %s269_s2 = inlined_call_operand.vmem [shape: f32[32,8], index: 2, kind: output, shape index: {0}]   ;;  %s270_s3 = inlined_call_operand.hbm [shape: f32[8,32], index: 3, kind: output, shape index: {1}]  }
   0x1   :  { %10 = vsyncpa [#allocation6], 0 }
   0x2   :  { %11 = vsyncpa [#allocation4], 0  ;;  %s218_s12 = smov [#allocation2]   ;;  %s219_s14 = smov [#allocation5]  }
   0x3   :  { %s18_s13 = sshll.u32 %s218_s12, 4  ;;  %s28_s15 = sshll.u32 %s219_s14, 4  ;;  %s19_s13 = int_to_ptr.vmem [resolvable:$true] %s18_s13  ;;  %s29_s15 = int_to_ptr.vmem [resolvable:$true] %s28_s15 }
   0x4   :  { %s160_s16 = scalar_lea.vmem %s19_s13, 128  ;;  %p165_p1 = scmp.lt.s32.totalorder %s19_s13, %s19_s13 }
   0x5   :  { %p161_p0 = scmp.ne.s32.totalorder %s19_s13, %s160_s16  ;;  %p166_p2 = scmp.lt.s32.totalorder %s160_s16, %s160_s16 }
   0x7   :  { %p167_p3 = por %p166_p2, %p165_p1 }
   0x9   :  { %p168_p4 = pnand %p167_p3, %p161_p0 }
   0xb   :  { %171 = shalt.err (!%p168_p4)
}
   0xc   :  { %21 = dma.hbm_to_vmem [thread:$0]  %s267_s0, 128, %s19_s13, [#allocation3]  }
   0xd   :  { %s180_s19 = scalar_lea.vmem %s29_s15, 128  ;;  %p185_p6 = scmp.lt.s32.totalorder %s29_s15, %s29_s15 }
   0xe   :  { %p181_p5 = scmp.ne.s32.totalorder %s29_s15, %s180_s19  ;;  %p186_p7 = scmp.lt.s32.totalorder %s180_s19, %s180_s19 }
  0x10   :  { %p187_p8 = por %p186_p7, %p185_p6 }
  0x12   :  { %p188_p9 = pnand %p187_p8, %p181_p5 }
  0x14   :  { %191 = shalt.err (!%p188_p9)
}
  0x15   :  { %31 = dma.hbm_to_vmem [thread:$0]  %s268_s1, 128, %s29_s15, [#allocation6]  }
  0x16   :  { %212 = dma.done.wait [#allocation3], 128  }
  0x17   :  { %213 = vsyncadd [#allocation3], 4294967168 }
  0x18   :  { %214 = dma.done.wait [#allocation6], 128  }
  0x19   :  { %215 = vsyncadd [#allocation6], 4294967168  ;;  %vm39_vm0 = vcmask 261120   ;;  %v38_v0 = vld [vmem:[#allocation2] sm:$0xff]  ;;  %v63_v6 = vld [vmem:[#allocation5] sm:$0xff]  ;;  %s220_s0 = smov [#allocation7]  }
  0x1a   :  { %v40_v1 = vsel %vm39_vm0, %v38_v0, 0.0  ;;  %v64_v7 = vsel %vm39_vm0, %v63_v6, 0.0  ;;  %s132_s1 = sshll.u32 %s220_s0, 4  ;;  %s133_s1 = int_to_ptr.vmem [resolvable:$true] %s132_s1 }
  0x1b   :  { %v41_v2 = vrot.slane %v40_v1, 4  ;;  %v65_v9 = vrot.slane %v64_v7, 4  ;;  %s192_s22 = scalar_lea.vmem %s133_s1, 128  ;;  %p197_p11 = scmp.lt.s32.totalorder %s133_s1, %s133_s1 }
  0x1c   :  { %p193_p10 = scmp.ne.s32.totalorder %s133_s1, %s192_s22  ;;  %p198_p12 = scmp.lt.s32.totalorder %s192_s22, %s192_s22 }
  0x1d   :  { %v42_v3 = vadd.f32 %v41_v2, %v40_v1  ;;  %v66_v11 = vadd.f32 %v65_v9, %v64_v7 }
  0x1e   :  { %p199_p13 = por %p198_p12, %p197_p11 }
  0x1f   :  { %v43_v4 = vrot.slane %v42_v3, 2  ;;  %v67_v13 = vrot.slane %v66_v11, 2 }
  0x20   :  { %p200_p0 = pnand %p199_p13, %p193_p10 }
  0x21   :  { %v44_v5 = vadd.f32 %v43_v4, %v42_v3  ;;  %v68_v15 = vadd.f32 %v67_v13, %v66_v11 }
  0x23   :  { %v45_v8 = vrot.slane %v44_v5, 1  ;;  %v69_v17 = vrot.slane %v68_v15, 1 }
  0x25   :  { %v46_v10 = vadd.f32 %v45_v8, %v44_v5  ;;  %v70_v19 = vadd.f32 %v69_v17, %v68_v15 }
  0x27   :  { %v48_v12 = vmul.f32 0.125, %v46_v10  ;;  %v71_v21 = vmul.f32 0.125, %v70_v19 }
  0x29   :  { %v49_v14 = vsub.f32 %v38_v0, %v48_v12  ;;  %v72_v23 = vsub.f32 %v63_v6, %v71_v21 }
  0x2b   :  { %v50_v16 = vmul.f32 %v49_v14, %v49_v14  ;;  %v73_v25 = vmul.f32 %v72_v23, %v72_v23 }
  0x2d   :  { %v51_v18 = vsel %vm39_vm0, %v50_v16, 0.0  ;;  %v74_v27 = vsel %vm39_vm0, %v73_v25, 0.0 }
  0x2e   :  { %v52_v20 = vrot.slane %v51_v18, 4  ;;  %v75_v29 = vrot.slane %v74_v27, 4 }
  0x30   :  { %v53_v22 = vadd.f32 %v52_v20, %v51_v18  ;;  %v76_v31 = vadd.f32 %v75_v29, %v74_v27 }
  0x32   :  { %v54_v24 = vrot.slane %v53_v22, 2  ;;  %v77_v33 = vrot.slane %v76_v31, 2 }
  0x34   :  { %v55_v26 = vadd.f32 %v54_v24, %v53_v22  ;;  %v78_v35 = vadd.f32 %v77_v33, %v76_v31 }
  0x36   :  { %v56_v28 = vrot.slane %v55_v26, 1  ;;  %v79_v36 = vrot.slane %v78_v35, 1 }
  0x38   :  { %v57_v30 = vadd.f32 %v56_v28, %v55_v26  ;;  %v80_v37 = vadd.f32 %v79_v36, %v78_v35 }
  0x3a   :  { %v58_v32 = vmul.f32 0.125, %v57_v30  ;;  %v81_v38 = vmul.f32 0.125, %v80_v37 }
  0x3c   :  { %v59_v34 = vadd.f32 1e-05, %v58_v32  ;;  %v82_v39 = vadd.f32 1e-05, %v81_v38 }
  0x3e   :  { %148 = vrsqrt.f32 %v59_v34 }
  0x3f   :  { %150 = vrsqrt.f32 %v82_v39 }
  0x4b   :  { %v149_v40 = vpop.eup %148 }
  0x4c   :  { %v61_v41 = vmul.f32 0.35355338, %v149_v40  ;;  %v151_v43 = vpop.eup %150 }
  0x4d   :  { %v84_v44 = vmul.f32 0.35355338, %v151_v43 }
  0x4e   :  { %v62_v42 = vmul.f32 %v61_v41, %v49_v14 }
  0x4f   :  { %v85_v45 = vmul.f32 %v84_v44, %v72_v23 }
  0x50   :  { %86 = vxpose.xlu0.b32.start.end [1/1] (short) (narrow) %v62_v42, 32 }
  0x51   :  { %123 = vst.msk [vmem:[#allocation7] sm:$0xff] %vm39_vm0, %v85_v45 }
  0x52   :  { %203 = shalt.err (!%p200_p0)
}
  0x53   :  { %135 = dma.vmem_to_hbm [thread:$0]  %s133_s1, 128, %s270_s3, [#allocation4]   ;;  %vm118_vm1 = vcmask 64512  }
  0xcc   :  { %v102_v46 = vpop.trf.xlu0 }
  0xcd   :  { %119 = vst.msk [vmem:[%s269_s2] sm:$0xff] %vm118_vm1, %v102_v46 }
  0xd0   :  { %v103_v47 = vpop.trf.xlu0 }
  0xd1   :  { %120 = vst.msk [vmem:[%s269_s2 + $0x8] sm:$0xff] %vm118_vm1, %v103_v47 }
  0xd4   :  { %v104_v48 = vpop.trf.xlu0 }
  0xd5   :  { %121 = vst.msk [vmem:[%s269_s2 + $0x10] sm:$0xff] %vm118_vm1, %v104_v48 }
  0xd8   :  { %v105_v49 = vpop.trf.xlu0 }
  0xd9   :  { %122 = vst.msk [vmem:[%s269_s2 + $0x18] sm:$0xff] %vm118_vm1, %v105_v49 }
  0xda   :  { %216 = dma.done.wait [#allocation4], 128  }
  0xdb   :  { %217 = vsyncadd [#allocation4], 4294967168 }
  0xdc   :  { %141 = vsyncpa [#allocation3], 1 }
  0xdd   :  { %142 = vsyncpa [#allocation6], 1 }
  0xde   :  { %143 = vsyncpa [#allocation4], 1 }

</bundles_post_ra>
